<compile_context>
chip_gen: v7x
topology: tpu7x:2x2x1
jax: 0.10.0
libtpu: 0.0.40
codegen_flags: <defaults>
</compile_context>

<pallas_src>
import functools

import jax
import jax.numpy as jnp
import numpy as np
from jax.experimental import pallas as pl
from jax.experimental.pallas import tpu as pltpu

TAU = 2.0
V_TH = 0.5
BN_EPS = 1e-5
_VMEM_LIMIT = 32 * 1024 * 1024  # explicit scoped-VMEM limit (v5e default is only 16 MiB)


# ---------------------------------------------------------------------------
# Kernel 1: token-mixing GEMM + BatchNorm batch-statistics accumulation.
# ---------------------------------------------------------------------------
def _mix_stats_kernel(x_ref, ap_ref, pp_ref, gamma_ref, beta_ref,
                      y_ref, scale_ref, shift_ref,
                      acc_sum, acc_sq, *, inv_count):
    i = pl.program_id(0)

    @pl.when(i == 0)
    def _():
        acc_sum[...] = jnp.zeros_like(acc_sum)
        acc_sq[...] = jnp.zeros_like(acc_sq)

    # One big lane-dense GEMM: (row_blk, ND) @ (ND, ND), f32 accumulation on the MXU.
    y = jnp.dot(x_ref[...], ap_ref[...], preferred_element_type=jnp.float32)
    y_ref[...] = y.astype(y_ref.dtype)

    # Per-lane partial sums for the BN batch statistics (channel of lane f is f % N).
    acc_sum[...] += jnp.sum(y, axis=0, keepdims=True)
    acc_sq[...] += jnp.sum(y * y, axis=0, keepdims=True)

    @pl.when(i == pl.num_programs(0) - 1)
    def _():
        # Pool lanes of the same BN channel and broadcast back to lane granularity
        # in a single (1, ND) @ (ND, ND) matmul (pp[f, g] = [f % N == g % N]).
        mean_l = jnp.dot(acc_sum[...], pp_ref[...],
                         preferred_element_type=jnp.float32) * inv_count
        ex2_l = jnp.dot(acc_sq[...], pp_ref[...],
                        preferred_element_type=jnp.float32) * inv_count
        var_l = ex2_l - mean_l * mean_l              # biased variance (training-mode BN)
        rstd_l = jax.lax.rsqrt(var_l + BN_EPS)
        scale = gamma_ref[...] * rstd_l
        scale_ref[...] = scale
        shift_ref[...] = beta_ref[...] - mean_l * scale
    # TODO(synk): running_mean / running_var updates (training-mode side effect) are not
    # materialized; they do not affect the forward output.


def _mix_and_stats(x2d, ap, ppool, gamma_l, beta_l, count):
    TB, ND = x2d.shape
    rblk = 256 if (TB > 256 and TB % 256 == 0) else TB
    kernel = functools.partial(_mix_stats_kernel, inv_count=1.0 / float(count))
    return pl.pallas_call(
        kernel,
        out_shape=(
            jax.ShapeDtypeStruct((TB, ND), jnp.float32),   # mixed activations (permuted layout)
            jax.ShapeDtypeStruct((1, ND), jnp.float32),    # fused BN scale (per lane)
            jax.ShapeDtypeStruct((1, ND), jnp.float32),    # fused BN shift (per lane)
        ),
        grid=(TB // rblk,),
        in_specs=[
            pl.BlockSpec((rblk, ND), lambda i: (i, 0)),
            pl.BlockSpec((ND, ND), lambda i: (0, 0)),
            pl.BlockSpec((ND, ND), lambda i: (0, 0)),
            pl.BlockSpec((1, ND), lambda i: (0, 0)),
            pl.BlockSpec((1, ND), lambda i: (0, 0)),
        ],
        out_specs=(
            pl.BlockSpec((rblk, ND), lambda i: (i, 0)),
            pl.BlockSpec((1, ND), lambda i: (0, 0)),
            pl.BlockSpec((1, ND), lambda i: (0, 0)),
        ),
        scratch_shapes=[pltpu.VMEM((1, ND), jnp.float32),
                        pltpu.VMEM((1, ND), jnp.float32)],
        compiler_params=pltpu.CompilerParams(
            dimension_semantics=("arbitrary",),            # stats reduce across row tiles
            vmem_limit_bytes=_VMEM_LIMIT),
    )(x2d, ap, ppool, gamma_l, beta_l)


# ---------------------------------------------------------------------------
# Kernel 2: BN normalization (fused scale/shift) + multi-step LIF neuron.
# grid = (spatial column tiles [parallel], T [arbitrary/sequential]).
# ---------------------------------------------------------------------------
def _bn_lif_kernel(y_ref, scale_ref, shift_ref, o_ref, v_ref):
    # Reset the membrane potential at t == 0 (keyed off the T grid axis, program_id(1)).
    @pl.when(pl.program_id(1) == 0)
    def _():
        v_ref[...] = jnp.zeros_like(v_ref)

    z = y_ref[0] * scale_ref[...] + shift_ref[...]     # BN normalize (row-broadcast)
    v = v_ref[...]
    h = v + (z - v) * (1.0 / TAU)                      # charge (decay_input=True, v_reset=0)
    spike = h >= V_TH                                  # Heaviside (surrogate is bwd-only)
    o_ref[0] = jnp.where(spike, 1.0, 0.0).astype(o_ref.dtype)
    v_ref[...] = jnp.where(spike, 0.0, h)              # hard reset to 0


def _bn_lif(y3d, scale_l, shift_l):
    T, B, ND = y3d.shape
    cblk = 512 if (ND > 512 and ND % 512 == 0) else ND
    n_cols = ND // cblk
    return pl.pallas_call(
        _bn_lif_kernel,
        out_shape=jax.ShapeDtypeStruct((T, B, ND), jnp.float32),
        grid=(n_cols, T),
        in_specs=[
            pl.BlockSpec((1, B, cblk), lambda s, t: (t, 0, s)),
            pl.BlockSpec((1, cblk), lambda s, t: (0, s)),
            pl.BlockSpec((1, cblk), lambda s, t: (0, s)),
        ],
        out_specs=pl.BlockSpec((1, B, cblk), lambda s, t: (t, 0, s)),
        scratch_shapes=[pltpu.VMEM((B, cblk), jnp.float32)],   # tile-sized membrane carry
        compiler_params=pltpu.CompilerParams(
            dimension_semantics=("parallel", "arbitrary"),
            vmem_limit_bytes=_VMEM_LIMIT),
    )(y3d, scale_l, shift_l)


# ---------------------------------------------------------------------------
# Full forward (all glue is free reshapes + tiny weight-side constant prep).
# ---------------------------------------------------------------------------
def token_mixer_forward(x, w, gamma, beta):
    T, B, N, D = x.shape
    TB, ND = T * B, N * D

    # Lane-dense carried layout: a free reshape of the PyTorch input.
    x2d = x.reshape(TB, ND)

    # Constant lane bookkeeping (channel of carried/permuted lane f is f % N).
    f = np.arange(ND)
    perm = (f % N) * D + (f // N)                                   # output-layout permutation
    ppool = jnp.asarray((f[:, None] % N == f[None, :] % N).astype(np.float32))

    # Kronecker-expanded token-mixing weight with pre-permuted output columns, so the
    # GEMM output is already in the final PyTorch layout (no XLA transpose anywhere).
    ap = jnp.kron(w.T, jnp.eye(D, dtype=w.dtype))[:, perm]

    # gamma/beta lane-major, expanded to per-lane vectors (tiny, weight-side).
    gamma_l = jnp.tile(gamma.astype(jnp.float32), D).reshape(1, ND)
    beta_l = jnp.tile(beta.astype(jnp.float32), D).reshape(1, ND)

    y2d, scale_l, shift_l = _mix_and_stats(x2d, ap, ppool, gamma_l, beta_l, TB * D)
    spikes = _bn_lif(y2d.reshape(T, B, ND), scale_l, shift_l)
    return spikes.reshape(T, B, N, D)                               # free reshape


# ---------------------------------------------------------------------------
# Pure-JAX reference (mirrors the PyTorch forward).
# ---------------------------------------------------------------------------
def token_mixer_ref(x, w, gamma, beta):
    T, B, N, D = x.shape
    xt = x.reshape(T * B, N, D).transpose(0, 2, 1)                  # (TB, D, N)
    y = jnp.einsum("bdn,mn->bdm", xt, w)                            # linear1 (no bias)
    yt = y.transpose(0, 2, 1)                                       # (TB, N, D)
    mean = yt.mean(axis=(0, 2), keepdims=True)
    var = ((yt - mean) ** 2).mean(axis=(0, 2), keepdims=True)
    yn = (yt - mean) * jax.lax.rsqrt(var + BN_EPS) * gamma[None, :, None] \
         + beta[None, :, None]
    z = yn.transpose(0, 2, 1).reshape(T, B, N, D)
    v = jnp.zeros((B, N, D), x.dtype)
    outs = []
    for t in range(T):
        h = v + (z[t] - v) / TAU
        s = (h >= V_TH).astype(x.dtype)
        v = h * (1.0 - s)
        outs.append(s)
    return jnp.stack(outs, 0)


if __name__ == "__main__":
    T, B, N, D = 4, 2, 8, 16                    # (timesteps, batch, seq_len, dim)
    key = jax.random.PRNGKey(0)
    kx, kw, kg, kb = jax.random.split(key, 4)

    x = jax.random.normal(kx, (T, B, N, D), jnp.float32)
    bound = 1.0 / (N ** 0.5)                    # nn.Linear default init range
    w = jax.random.uniform(kw, (N, N), jnp.float32, -bound, bound)
    gamma = jax.random.uniform(kg, (N,), jnp.float32, 0.5, 1.5)
    beta = jax.random.uniform(kb, (N,), jnp.float32, -0.1, 0.1)

    fwd = jax.jit(token_mixer_forward)
    out = jax.block_until_ready(fwd(x, w, gamma, beta))

    ref = token_mixer_ref(x, w, gamma, beta)
    assert out.shape == (T, B, N, D) and out.dtype == jnp.float32
    assert bool(jnp.all((out == 0.0) | (out == 1.0)))
    mismatches = int(jnp.sum(jnp.abs(out - ref) > 1e-3))
    # allow a couple of threshold-boundary spike flips from accumulation-order differences
    assert mismatches <= 2, f"too many mismatches vs reference: {mismatches}"

    print("KERNEL_OK")
</pallas_src>

<mosaic_0001>
module attributes {stable_mosaic.version = 11 : i64} {
  func.func @_mix_stats_kernel(%arg0: i32, %arg1: memref<8x128xf32, #tpu.memory_space<vmem>>, %arg2: memref<128x128xf32, #tpu.memory_space<vmem>>, %arg3: memref<128x128xf32, #tpu.memory_space<vmem>>, %arg4: memref<1x128xf32, #tpu.memory_space<vmem>>, %arg5: memref<1x128xf32, #tpu.memory_space<vmem>>, %arg6: memref<8x128xf32, #tpu.memory_space<vmem>>, %arg7: memref<1x128xf32, #tpu.memory_space<vmem>>, %arg8: memref<1x128xf32, #tpu.memory_space<vmem>>, %arg9: memref<1x128xf32, #tpu.memory_space<vmem>>, %arg10: memref<1x128xf32, #tpu.memory_space<vmem>>) attributes {dimension_semantics = [#tpu.dimension_semantics<arbitrary>], iteration_bounds = array<i64: 1>, scalar_prefetch = 0 : i64, scratch_operands = 2 : i64, tpu.core_type = #tpu.core_type<tc>, window_params = [{transform_indices = @transform_0, window_bounds = array<i64: 8, 128>}, {pipeline_mode = #tpu.pipeline_mode<synchronous>, transform_indices = @transform_1, window_bounds = array<i64: 128, 128>}, {pipeline_mode = #tpu.pipeline_mode<synchronous>, transform_indices = @transform_2, window_bounds = array<i64: 128, 128>}, {pipeline_mode = #tpu.pipeline_mode<synchronous>, transform_indices = @transform_3, window_bounds = array<i64: 1, 128>}, {pipeline_mode = #tpu.pipeline_mode<synchronous>, transform_indices = @transform_4, window_bounds = array<i64: 1, 128>}, {transform_indices = @transform_5, window_bounds = array<i64: 8, 128>}, {pipeline_mode = #tpu.pipeline_mode<synchronous>, transform_indices = @transform_6, window_bounds = array<i64: 1, 128>}, {pipeline_mode = #tpu.pipeline_mode<synchronous>, transform_indices = @transform_7, window_bounds = array<i64: 1, 128>}]} {
    %c0_i32 = arith.constant 0 : i32
    %0 = arith.cmpi eq, %arg0, %c0_i32 : i32
    %1 = arith.extui %0 : i1 to i32
    %c0_i32_0 = arith.constant 0 : i32
    %2 = arith.cmpi ne, %1, %c0_i32_0 : i32
    scf.if %2 {
      %cst_18 = arith.constant 0.000000e+00 : f32
      %21 = vector.broadcast %cst_18 : f32 to vector<1x128xf32>
      %c0_19 = arith.constant 0 : index
      %c0_20 = arith.constant 0 : index
      %22 = vector.load %arg9[%c0_19, %c0_20] : memref<1x128xf32, #tpu.memory_space<vmem>>, vector<1x128xf32>
      tpu.vector_store %arg9[%c0_19, %c0_20], %21 {strides = array<i32>} : memref<1x128xf32, #tpu.memory_space<vmem>>, vector<1x128xf32>,
      %cst_21 = arith.constant 0.000000e+00 : f32
      %23 = vector.broadcast %cst_21 : f32 to vector<1x128xf32>
      %c0_22 = arith.constant 0 : index
      %c0_23 = arith.constant 0 : index
      %24 = vector.load %arg10[%c0_22, %c0_23] : memref<1x128xf32, #tpu.memory_space<vmem>>, vector<1x128xf32>
      tpu.vector_store %arg10[%c0_22, %c0_23], %23 {strides = array<i32>} : memref<1x128xf32, #tpu.memory_space<vmem>>, vector<1x128xf32>,
    } else {
    }
    %c0 = arith.constant 0 : index
    %c0_1 = arith.constant 0 : index
    %3 = vector.load %arg1[%c0, %c0_1] : memref<8x128xf32, #tpu.memory_space<vmem>>, vector<8x128xf32>
    %c0_2 = arith.constant 0 : index
    %c0_3 = arith.constant 0 : index
    %4 = vector.load %arg2[%c0_2, %c0_3] : memref<128x128xf32, #tpu.memory_space<vmem>>, vector<128x128xf32>
    %cst = arith.constant dense<0.000000e+00> : vector<8x128xf32>
    %5 = tpu.matmul %3, %4, %cst {dimension_numbers = #tpu.dot_dimension_numbers<[1], [0], [0], [1], [0, 0, 1, 1], [], []>} : vector<8x128xf32>, vector<128x128xf32>, vector<8x128xf32> -> vector<8x128xf32>
    %c0_4 = arith.constant 0 : index
    %c0_5 = arith.constant 0 : index
    %6 = vector.load %arg6[%c0_4, %c0_5] : memref<8x128xf32, #tpu.memory_space<vmem>>, vector<8x128xf32>
    tpu.vector_store %arg6[%c0_4, %c0_5], %5 {strides = array<i32>} : memref<8x128xf32, #tpu.memory_space<vmem>>, vector<8x128xf32>,
    %c0_6 = arith.constant 0 : index
    %c0_7 = arith.constant 0 : index
    %7 = vector.load %arg9[%c0_6, %c0_7] : memref<1x128xf32, #tpu.memory_space<vmem>>, vector<1x128xf32>
    %cst_8 = arith.constant dense<0.000000e+00> : vector<128xf32>
    %8 = vector.multi_reduction <add>, %5, %cst_8 [0] : vector<8x128xf32> to vector<128xf32>
    %9 = vector.shape_cast %8 : vector<128xf32> to vector<1x128xf32>
    %10 = arith.addf %7, %9 : vector<1x128xf32>
    %c0_9 = arith.constant 0 : index
    %c0_10 = arith.constant 0 : index
    %11 = vector.load %arg9[%c0_9, %c0_10] : memref<1x128xf32, #tpu.memory_space<vmem>>, vector<1x128xf32>
    tpu.vector_store %arg9[%c0_9, %c0_10], %10 {strides = array<i32>} : memref<1x128xf32, #tpu.memory_space<vmem>>, vector<1x128xf32>,
    %c0_11 = arith.constant 0 : index
    %c0_12 = arith.constant 0 : index
    %12 = vector.load %arg10[%c0_11, %c0_12] : memref<1x128xf32, #tpu.memory_space<vmem>>, vector<1x128xf32>
    %13 = arith.mulf %5, %5 : vector<8x128xf32>
    %cst_13 = arith.constant dense<0.000000e+00> : vector<128xf32>
    %14 = vector.multi_reduction <add>, %13, %cst_13 [0] : vector<8x128xf32> to vector<128xf32>
    %15 = vector.shape_cast %14 : vector<128xf32> to vector<1x128xf32>
    %16 = arith.addf %12, %15 : vector<1x128xf32>
    %c0_14 = arith.constant 0 : index
    %c0_15 = arith.constant 0 : index
    %17 = vector.load %arg10[%c0_14, %c0_15] : memref<1x128xf32, #tpu.memory_space<vmem>>, vector<1x128xf32>
    tpu.vector_store %arg10[%c0_14, %c0_15], %16 {strides = array<i32>} : memref<1x128xf32, #tpu.memory_space<vmem>>, vector<1x128xf32>,
    %c0_i32_16 = arith.constant 0 : i32
    %18 = arith.cmpi eq, %arg0, %c0_i32_16 : i32
    %19 = arith.extui %18 : i1 to i32
    %c0_i32_17 = arith.constant 0 : i32
    %20 = arith.cmpi ne, %19, %c0_i32_17 : i32
    scf.if %20 {
      %c0_18 = arith.constant 0 : index
      %c0_19 = arith.constant 0 : index
      %21 = vector.load %arg9[%c0_18, %c0_19] : memref<1x128xf32, #tpu.memory_space<vmem>>, vector<1x128xf32>
      %c0_20 = arith.constant 0 : index
      %c0_21 = arith.constant 0 : index
      %22 = vector.load %arg3[%c0_20, %c0_21] : memref<128x128xf32, #tpu.memory_space<vmem>>, vector<128x128xf32>
      %cst_22 = arith.constant dense<0.000000e+00> : vector<1x128xf32>
      %23 = tpu.matmul %21, %22, %cst_22 {dimension_numbers = #tpu.dot_dimension_numbers<[1], [0], [0], [1], [0, 0, 1, 1], [], []>} : vector<1x128xf32>, vector<128x128xf32>, vector<1x128xf32> -> vector<1x128xf32>
      %cst_23 = arith.constant 7.812500e-03 : f32
      %24 = vector.broadcast %cst_23 : f32 to vector<1x128xf32>
      %25 = arith.mulf %23, %24 : vector<1x128xf32>
      %c0_24 = arith.constant 0 : index
      %c0_25 = arith.constant 0 : index
      %26 = vector.load %arg10[%c0_24, %c0_25] : memref<1x128xf32, #tpu.memory_space<vmem>>, vector<1x128xf32>
      %c0_26 = arith.constant 0 : index
      %c0_27 = arith.constant 0 : index
      %27 = vector.load %arg3[%c0_26, %c0_27] : memref<128x128xf32, #tpu.memory_space<vmem>>, vector<128x128xf32>
      %cst_28 = arith.constant dense<0.000000e+00> : vector<1x128xf32>
      %28 = tpu.matmul %26, %27, %cst_28 {dimension_numbers = #tpu.dot_dimension_numbers<[1], [0], [0], [1], [0, 0, 1, 1], [], []>} : vector<1x128xf32>, vector<128x128xf32>, vector<1x128xf32> -> vector<1x128xf32>
      %cst_29 = arith.constant 7.812500e-03 : f32
      %29 = vector.broadcast %cst_29 : f32 to vector<1x128xf32>
      %30 = arith.mulf %28, %29 : vector<1x128xf32>
      %31 = arith.mulf %25, %25 : vector<1x128xf32>
      %32 = arith.subf %30, %31 : vector<1x128xf32>
      %cst_30 = arith.constant 9.99999974E-6 : f32
      %33 = vector.broadcast %cst_30 : f32 to vector<1x128xf32>
      %34 = arith.addf %32, %33 : vector<1x128xf32>
      %35 = math.rsqrt %34 : vector<1x128xf32>
      %c0_31 = arith.constant 0 : index
      %c0_32 = arith.constant 0 : index
      %36 = vector.load %arg4[%c0_31, %c0_32] : memref<1x128xf32, #tpu.memory_space<vmem>>, vector<1x128xf32>
      %37 = arith.mulf %36, %35 : vector<1x128xf32>
      %c0_33 = arith.constant 0 : index
      %c0_34 = arith.constant 0 : index
      %38 = vector.load %arg7[%c0_33, %c0_34] : memref<1x128xf32, #tpu.memory_space<vmem>>, vector<1x128xf32>
      tpu.vector_store %arg7[%c0_33, %c0_34], %37 {strides = array<i32>} : memref<1x128xf32, #tpu.memory_space<vmem>>, vector<1x128xf32>,
      %c0_35 = arith.constant 0 : index
      %c0_36 = arith.constant 0 : index
      %39 = vector.load %arg5[%c0_35, %c0_36] : memref<1x128xf32, #tpu.memory_space<vmem>>, vector<1x128xf32>
      %40 = arith.mulf %25, %37 : vector<1x128xf32>
      %41 = arith.subf %39, %40 : vector<1x128xf32>
      %c0_37 = arith.constant 0 : index
      %c0_38 = arith.constant 0 : index
      %42 = vector.load %arg8[%c0_37, %c0_38] : memref<1x128xf32, #tpu.memory_space<vmem>>, vector<1x128xf32>
      tpu.vector_store %arg8[%c0_37, %c0_38], %41 {strides = array<i32>} : memref<1x128xf32, #tpu.memory_space<vmem>>, vector<1x128xf32>,
    } else {
    }
    return
  }
  func.func @transform_0(%arg0: i32) -> (i32, i32) {
    %c0_i32 = arith.constant 0 : i32
    %c0_i32_0 = arith.constant 0 : i32
    return %arg0, %c0_i32 : i32, i32
  }
  func.func @transform_1(%arg0: i32) -> (i32, i32) {
    %c0_i32 = arith.constant 0 : i32
    %c0_i32_0 = arith.constant 0 : i32
    %c0_i32_1 = arith.constant 0 : i32
    return %c0_i32, %c0_i32_0 : i32, i32
  }
  func.func @transform_2(%arg0: i32) -> (i32, i32) {
    %c0_i32 = arith.constant 0 : i32
    %c0_i32_0 = arith.constant 0 : i32
    %c0_i32_1 = arith.constant 0 : i32
    return %c0_i32, %c0_i32_0 : i32, i32
  }
  func.func @transform_3(%arg0: i32) -> (i32, i32) {
    %c0_i32 = arith.constant 0 : i32
    %c0_i32_0 = arith.constant 0 : i32
    %c0_i32_1 = arith.constant 0 : i32
    return %c0_i32, %c0_i32_0 : i32, i32
  }
  func.func @transform_4(%arg0: i32) -> (i32, i32) {
    %c0_i32 = arith.constant 0 : i32
    %c0_i32_0 = arith.constant 0 : i32
    %c0_i32_1 = arith.constant 0 : i32
    return %c0_i32, %c0_i32_0 : i32, i32
  }
  func.func @transform_5(%arg0: i32) -> (i32, i32) {
    %c0_i32 = arith.constant 0 : i32
    %c0_i32_0 = arith.constant 0 : i32
    return %arg0, %c0_i32 : i32, i32
  }
  func.func @transform_6(%arg0: i32) -> (i32, i32) {
    %c0_i32 = arith.constant 0 : i32
    %c0_i32_0 = arith.constant 0 : i32
    %c0_i32_1 = arith.constant 0 : i32
    return %c0_i32, %c0_i32_0 : i32, i32
  }
  func.func @transform_7(%arg0: i32) -> (i32, i32) {
    %c0_i32 = arith.constant 0 : i32
    %c0_i32_0 = arith.constant 0 : i32
    %c0_i32_1 = arith.constant 0 : i32
    return %c0_i32, %c0_i32_0 : i32, i32
  }
}

module attributes {stable_mosaic.version = 11 : i64} {
  func.func @_bn_lif_kernel(%arg0: i32, %arg1: i32, %arg2: memref<1x2x128xf32, #tpu.memory_space<vmem>>, %arg3: memref<1x128xf32, #tpu.memory_space<vmem>>, %arg4: memref<1x128xf32, #tpu.memory_space<vmem>>, %arg5: memref<1x2x128xf32, #tpu.memory_space<vmem>>, %arg6: memref<2x128xf32, #tpu.memory_space<vmem>>) attributes {dimension_semantics = [#tpu.dimension_semantics<parallel>, #tpu.dimension_semantics<arbitrary>], iteration_bounds = array<i64: 1, 4>, scalar_prefetch = 0 : i64, scratch_operands = 1 : i64, tpu.core_type = #tpu.core_type<tc>, window_params = [{transform_indices = @transform_0, window_bounds = array<i64: 1, 2, 128>}, {transform_indices = @transform_1, window_bounds = array<i64: 1, 128>}, {transform_indices = @transform_2, window_bounds = array<i64: 1, 128>}, {transform_indices = @transform_3, window_bounds = array<i64: 1, 2, 128>}]} {
    %c0_i32 = arith.constant 0 : i32
    %0 = arith.cmpi eq, %arg1, %c0_i32 : i32
    %1 = arith.extui %0 : i1 to i32
    %c0_i32_0 = arith.constant 0 : i32
    %2 = arith.cmpi ne, %1, %c0_i32_0 : i32
    scf.if %2 {
      %cst_18 = arith.constant 0.000000e+00 : f32
      %27 = vector.broadcast %cst_18 : f32 to vector<2x128xf32>
      %c0_19 = arith.constant 0 : index
      %c0_20 = arith.constant 0 : index
      %28 = vector.load %arg6[%c0_19, %c0_20] : memref<2x128xf32, #tpu.memory_space<vmem>>, vector<2x128xf32>
      tpu.vector_store %arg6[%c0_19, %c0_20], %27 {strides = array<i32>} : memref<2x128xf32, #tpu.memory_space<vmem>>, vector<2x128xf32>,
    } else {
    }
    %c0 = arith.constant 0 : index
    %c0_1 = arith.constant 0 : index
    %c0_2 = arith.constant 0 : index
    %3 = vector.load %arg2[%c0, %c0_1, %c0_2] : memref<1x2x128xf32, #tpu.memory_space<vmem>>, vector<1x2x128xf32>
    %4 = vector.shape_cast %3 : vector<1x2x128xf32> to vector<2x128xf32>
    %c0_3 = arith.constant 0 : index
    %c0_4 = arith.constant 0 : index
    %5 = vector.load %arg3[%c0_3, %c0_4] : memref<1x128xf32, #tpu.memory_space<vmem>>, vector<1x128xf32>
    %6 = vector.broadcast %5 : vector<1x128xf32> to vector<2x128xf32>
    %7 = arith.mulf %4, %6 : vector<2x128xf32>
    %c0_5 = arith.constant 0 : index
    %c0_6 = arith.constant 0 : index
    %8 = vector.load %arg4[%c0_5, %c0_6] : memref<1x128xf32, #tpu.memory_space<vmem>>, vector<1x128xf32>
    %9 = vector.broadcast %8 : vector<1x128xf32> to vector<2x128xf32>
    %10 = arith.addf %7, %9 : vector<2x128xf32>
    %c0_7 = arith.constant 0 : index
    %c0_8 = arith.constant 0 : index
    %11 = vector.load %arg6[%c0_7, %c0_8] : memref<2x128xf32, #tpu.memory_space<vmem>>, vector<2x128xf32>
    %12 = arith.subf %10, %11 : vector<2x128xf32>
    %cst = arith.constant 5.000000e-01 : f32
    %13 = vector.broadcast %cst : f32 to vector<2x128xf32>
    %14 = arith.mulf %12, %13 : vector<2x128xf32>
    %15 = arith.addf %11, %14 : vector<2x128xf32>
    %cst_9 = arith.constant 5.000000e-01 : f32
    %16 = vector.broadcast %cst_9 : f32 to vector<2x128xf32>
    %17 = arith.cmpf oge, %15, %16 : vector<2x128xf32>
    %cst_10 = arith.constant 1.000000e+00 : f32
    %cst_11 = arith.constant 0.000000e+00 : f32
    %18 = vector.broadcast %cst_10 : f32 to vector<2x128xf32>
    %19 = vector.broadcast %cst_11 : f32 to vector<2x128xf32>
    %20 = arith.select %17, %18, %19 : vector<2x128xi1>, vector<2x128xf32>
    %c0_12 = arith.constant 0 : index
    %c0_13 = arith.constant 0 : index
    %c0_14 = arith.constant 0 : index
    %21 = vector.load %arg5[%c0_12, %c0_13, %c0_14] : memref<1x2x128xf32, #tpu.memory_space<vmem>>, vector<1x2x128xf32>
    %22 = vector.shape_cast %21 : vector<1x2x128xf32> to vector<2x128xf32>
    %23 = vector.shape_cast %20 : vector<2x128xf32> to vector<1x2x128xf32>
    tpu.vector_store %arg5[%c0_12, %c0_13, %c0_14], %23 {strides = array<i32>} : memref<1x2x128xf32, #tpu.memory_space<vmem>>, vector<1x2x128xf32>,
    %cst_15 = arith.constant 0.000000e+00 : f32
    %24 = vector.broadcast %cst_15 : f32 to vector<2x128xf32>
    %25 = arith.select %17, %24, %15 : vector<2x128xi1>, vector<2x128xf32>
    %c0_16 = arith.constant 0 : index
    %c0_17 = arith.constant 0 : index
    %26 = vector.load %arg6[%c0_16, %c0_17] : memref<2x128xf32, #tpu.memory_space<vmem>>, vector<2x128xf32>
    tpu.vector_store %arg6[%c0_16, %c0_17], %25 {strides = array<i32>} : memref<2x128xf32, #tpu.memory_space<vmem>>, vector<2x128xf32>,
    return
  }
  func.func @transform_0(%arg0: i32, %arg1: i32) -> (i32, i32, i32) {
    %c0_i32 = arith.constant 0 : i32
    %c0_i32_0 = arith.constant 0 : i32
    return %arg1, %c0_i32, %arg0 : i32, i32, i32
  }
  func.func @transform_1(%arg0: i32, %arg1: i32) -> (i32, i32) {
    %c0_i32 = arith.constant 0 : i32
    %c0_i32_0 = arith.constant 0 : i32
    return %c0_i32, %arg0 : i32, i32
  }
  func.func @transform_2(%arg0: i32, %arg1: i32) -> (i32, i32) {
    %c0_i32 = arith.constant 0 : i32
    %c0_i32_0 = arith.constant 0 : i32
    return %c0_i32, %arg0 : i32, i32
  }
  func.func @transform_3(%arg0: i32, %arg1: i32) -> (i32, i32, i32) {
    %c0_i32 = arith.constant 0 : i32
    %c0_i32_0 = arith.constant 0 : i32
    return %arg1, %c0_i32, %arg0 : i32, i32, i32
  }
}

</mosaic_0001>

<bundles_post_ra>
// kernel: tile.13
= control target key start
LH: loop header
LB: loop body
LE: loop exit
PB: predicated region body
PF: predicated region fallthrough
CT: control target
= control target key end

     0   :  { %s28_s0 = inlined_call_operand.vmem [shape: f32[8], index: 0, kind: input, shape index: {}]   ;;  %s29_s1 = inlined_call_operand.vmem [shape: f32[16,8], index: 1, kind: output, shape index: {}]  }
   0x1   :  { %v4_v0 = vld [vmem:[%s28_s0] ss:$0 sm:$0xff] }
   0x2   :  { %5 = vst [vmem:[%s29_s1] sm:$0xff] %v4_v0  ;;  %8 = vst [vmem:[%s29_s1 + $0x8] sm:$0xff] %v4_v0 }

// kernel: tile.14
= control target key start
LH: loop header
LB: loop body
LE: loop exit
PB: predicated region body
PF: predicated region fallthrough
CT: control target
= control target key end

     0   :  { %s131_s10 = smov 120   ;;  %s132_s11 = smov 104   ;;  %vm3_vm0 = vcmask 64512   ;;  %vm9_vm1 = vcmask 1048512   ;;  %vm15_vm2 = vcmask 982912   ;;  %vm21_vm3 = vcmask 917312   ;;  %s207_s0 = inlined_call_operand.vmem [shape: f32[16,8], index: 0, kind: input, shape index: {}]   ;;  %s208_s1 = inlined_call_operand.vmem [shape: f32[1,128], index: 1, kind: output, shape index: {}]  }
   0x1   :  { %v101_v0 = vld [vmem:[%s207_s0 + $0xf] sm:$0x1]   ;;  %v103_v1 = vld [vmem:[%s207_s0 + $0xd] sm:$0x1]   ;;  %v102_v2 = vld [vmem:[%s207_s0 + $0xe] sm:$0x1]  }
   0x2   :  { %7 = vrot.lane.b32.xlu0 %v101_v0, %s131_s10  ;;  %19 = vrot.lane.b32.xlu1 %v103_v1, %s132_s11  ;;  %v104_v3 = vld [vmem:[%s207_s0 + $0xc] sm:$0x1]   ;;  %s133_s16 = smov 112   ;;  %s134_s17 = smov 96   ;;  %v105_v4 = vld [vmem:[%s207_s0 + $0xb] sm:$0x1]  }
   0x3   :  { %v106_v5 = vld [vmem:[%s207_s0 + $0xa] sm:$0x1]   ;;  %v2_v6 = vld [vmem:[%s207_s0] sm:$0x1]   ;;  %s135_s24 = smov 88   ;;  %s136_s25 = smov 80  }
   0x4   :  { %4 = vst.msk [vmem:[#allocation0] sm:$0x1] %vm3_vm0, %v2_v6   ;;  %v107_v7 = vld [vmem:[%s207_s0 + $0x9] sm:$0x1]   ;;  %v108_v8 = vld [vmem:[%s207_s0 + $0x8] sm:$0x1]  }
   0x5   :  { %s137_s30 = smov 72   ;;  %s138_s2 = smov 64   ;;  %v109_v9 = vld [vmem:[%s207_s0 + $0x7] sm:$0x1]   ;;  %v110_v10 = vld [vmem:[%s207_s0 + $0x6] sm:$0x1]  }
   0x6   :  { %13 = vrot.lane.b32.xlu0 %v102_v2, %s133_s16  ;;  %25 = vrot.lane.b32.xlu1 %v104_v3, %s134_s17  ;;  %s139_s7 = smov 56   ;;  %s140_s8 = smov 48   ;;  %v111_v11 = vld [vmem:[%s207_s0 + $0x5] sm:$0x1]   ;;  %v112_v12 = vld [vmem:[%s207_s0 + $0x4] sm:$0x1]  }
   0x7   :  { %s141_s13 = smov 40   ;;  %s142_s14 = smov 32   ;;  %v113_v13 = vld [vmem:[%s207_s0 + $0x3] sm:$0x1]   ;;  %v114_v14 = vld [vmem:[%s207_s0 + $0x2] sm:$0x1]  }
   0x8   :  { %s143_s19 = smov 24   ;;  %s144_s20 = smov 16   ;;  %v115_v15 = vld [vmem:[%s207_s0 + $0x1] sm:$0x1]   ;;  %vm27_vm4 = vcmask 851712   ;;  %vm33_vm5 = vcmask 786112  }
   0x9   :  { %s145_s0 = smov 8   ;;  %vm39_vm6 = vcmask 720512   ;;  %vm45_vm7 = vcmask 654912   ;;  %vm51_vm8 = vcmask 589312   ;;  %vm57_vm9 = vcmask 523712  }
   0xa   :  { %31 = vrot.lane.b32.xlu0 %v105_v4, %s135_s24  ;;  %37 = vrot.lane.b32.xlu1 %v106_v5, %s136_s25  ;;  %vm63_vm10 = vcmask 458112   ;;  %vm69_vm11 = vcmask 392512   ;;  %vm75_vm12 = vcmask 326912   ;;  %vm81_vm13 = vcmask 261312  }
   0xb   :  { %vm87_vm14 = vcmask 195712   ;;  %vm93_vm15 = vcmask 130112  }
   0xe   :  { %43 = vrot.lane.b32.xlu0 %v107_v7, %s137_s30  ;;  %49 = vrot.lane.b32.xlu1 %v108_v8, %s138_s2 }
  0x12   :  { %55 = vrot.lane.b32.xlu0 %v109_v9, %s139_s7  ;;  %61 = vrot.lane.b32.xlu1 %v110_v10, %s140_s8 }
  0x16   :  { %67 = vrot.lane.b32.xlu0 %v111_v11, %s141_s13  ;;  %73 = vrot.lane.b32.xlu1 %v112_v12, %s142_s14 }
  0x1a   :  { %79 = vrot.lane.b32.xlu0 %v113_v13, %s143_s19  ;;  %85 = vrot.lane.b32.xlu1 %v114_v14, %s144_s20 }
  0x1e   :  { %91 = vrot.lane.b32.xlu0 %v115_v15, %s145_s0 }
  0x74   :  { %v8_v16 = vpop.permute.xlu0 %7   ;;  %v20_v17 = vpop.permute.xlu1 %19  }
  0x75   :  { %10 = vst.msk [vmem:[#allocation0] sm:$0x1] %vm9_vm1, %v8_v16  }
  0x78   :  { %v14_v18 = vpop.permute.xlu0 %13   ;;  %v26_v19 = vpop.permute.xlu1 %25  }
  0x79   :  { %16 = vst.msk [vmem:[#allocation0] sm:$0x1] %vm15_vm2, %v14_v18  }
  0x7a   :  { %22 = vst.msk [vmem:[#allocation0] sm:$0x1] %vm21_vm3, %v20_v17  }
  0x7b   :  { %28 = vst.msk [vmem:[#allocation0] sm:$0x1] %vm27_vm4, %v26_v19  }
  0x7c   :  { %v32_v20 = vpop.permute.xlu0 %31   ;;  %v38_v21 = vpop.permute.xlu1 %37  }
  0x7d   :  { %34 = vst.msk [vmem:[#allocation0] sm:$0x1] %vm33_vm5, %v32_v20  }
  0x7e   :  { %40 = vst.msk [vmem:[#allocation0] sm:$0x1] %vm39_vm6, %v38_v21  }
  0x80   :  { %v44_v22 = vpop.permute.xlu0 %43   ;;  %v50_v23 = vpop.permute.xlu1 %49  }
  0x81   :  { %46 = vst.msk [vmem:[#allocation0] sm:$0x1] %vm45_vm7, %v44_v22  }
  0x82   :  { %52 = vst.msk [vmem:[#allocation0] sm:$0x1] %vm51_vm8, %v50_v23  }
  0x84   :  { %v56_v24 = vpop.permute.xlu0 %55   ;;  %v62_v25 = vpop.permute.xlu1 %61  }
  0x85   :  { %58 = vst.msk [vmem:[#allocation0] sm:$0x1] %vm57_vm9, %v56_v24  }
  0x86   :  { %64 = vst.msk [vmem:[#allocation0] sm:$0x1] %vm63_vm10, %v62_v25  }
  0x88   :  { %v68_v26 = vpop.permute.xlu0 %67   ;;  %v74_v27 = vpop.permute.xlu1 %73  }
  0x89   :  { %70 = vst.msk [vmem:[#allocation0] sm:$0x1] %vm69_vm11, %v68_v26  }
  0x8a   :  { %76 = vst.msk [vmem:[#allocation0] sm:$0x1] %vm75_vm12, %v74_v27  }
  0x8c   :  { %v80_v28 = vpop.permute.xlu0 %79   ;;  %v86_v29 = vpop.permute.xlu1 %85  }
  0x8d   :  { %82 = vst.msk [vmem:[#allocation0] sm:$0x1] %vm81_vm13, %v80_v28  }
  0x8e   :  { %88 = vst.msk [vmem:[#allocation0] sm:$0x1] %vm87_vm14, %v86_v29  }
  0x90   :  { %v92_v30 = vpop.permute.xlu0 %91  }
  0x91   :  { %94 = vst.msk [vmem:[#allocation0] sm:$0x1] %vm93_vm15, %v92_v30  }
  0x98   :  { %v98_v31 = vld [vmem:[#allocation0] sm:$0x1] }
  0x99   :  { %100 = vst [vmem:[%s208_s1] sm:$0x1] %v98_v31 }

// kernel: token_mixer_forward.3
= control target key start
LH: loop header
LB: loop body
LE: loop exit
PB: predicated region body
PF: predicated region fallthrough
CT: control target
= control target key end

     0   :  { %s441_s12 = smov 0   ;;  %s443_s13 = smov 0   ;;  %s480_s0 = inlined_call_operand.vmem [shape: f32[4,2,128], index: 0, kind: input, shape index: {}]   ;;  %s481_s1 = inlined_call_operand.vmem [shape: f32[1,128], index: 1, kind: input, shape index: {}]   ;;  %s482_s2 = inlined_call_operand.vmem [shape: f32[1,128], index: 2, kind: input, shape index: {}]   ;;  %s483_s3 = inlined_call_operand.vmem [shape: f32[4,2,128], index: 3, kind: output, shape index: {}]  }
   0x1   :  { %s445_s14 = smov 0  }
   0x2 LB: > { %s22_s15 = sadd.s32 1, %s413_s13  ;;  %p361_p0 = scmp.ge.s32.totalorder %s417_s14, 1  ;;  %s417_s14 = sphi %s445_s14, %s13_s14   ;;  %s413_s13 = sphi %s443_s13, %s485_s13   ;;  %s409_s12 = sphi %s441_s12, %s484_s12  }
   0x3   : > { %p23_p1 = scmp.ge.s32.totalorder %s22_s15, 4  ;;  %p171_p2 = scmp.lt.s32.totalorder %s417_s14, 5 }
   0x5   : > { %s487_s15 = smov (%p23_p1, %s22_s15), 0  ;;  %p172_p3 = pnand %p361_p0, %p171_p2 }
   0x6   : > { %p205_p4 = scmp.lt.s32.totalorder (!%p172_p3), %s409_s12, 3  ;;  %p364_p5 = scmp.ne.s32.totalorder (!%p172_p3), %s409_s12, 0 }
   0x7   : > { %175 = sbr.rel (%p172_p3) target bundleno = 37 (0x25), region = 32 }
   0xe   : > { %s206_s16 = scalar_select %p205_p4, %s409_s12, 3 }
   0xf   : > { %228 = sbr.rel (%p364_p5) target bundleno = 22 (0x16), region = 36  ;;  %v419_v0 = vmov (!%p364_p5), 0.0  }
  0x10   : > { %s362_s17 = sshll.u32 %s206_s16, 1  ;;  %229 = vst [vmem:[#allocation2] sm:$0x3] (!%p364_p5), %v419_v0 }
  0x11   : > { %s211_s20 = scalar_lea.vmem %s480_s0, %s362_s17  ;;  %s224_s23 = scalar_lea.vmem %s483_s3, %s362_s17 }
  0x16 PF: > { %v230_v1 = vld [vmem:[%s211_s20] sm:$0x3]  ;;  %v420_v10 = vmov 0.0  }
  0x17   : > { %v365_v2 = vld [vmem:[%s481_s1] ss:$0 sm:$0xff] }
  0x18   : > { %v366_v3 = vld [vmem:[%s482_s2] ss:$0 sm:$0xff]  ;;  %v238_v4 = vmul.f32 %v365_v2, %v230_v1 }
  0x19   : > { %v247_v5 = vld [vmem:[#allocation2] sm:$0x3] }
  0x1a   : > { %v246_v6 = vadd.f32 %v366_v3, %v238_v4 }
  0x1c   : > { %v248_v7 = vsub.f32 %v246_v6, %v247_v5 }
  0x1e   : > { %v249_v8 = vmul.f32 0.5, %v248_v7 }
  0x20   : > { %v250_v9 = vadd.f32 %v249_v8, %v247_v5 }
  0x22   : > { %vm251_vm0 = vcmp.ge.f32.partialorder %v250_v9, 0.5 }
  0x23   : > { %v252_v11 = vsel %vm251_vm0, 1.0, %v420_v10  ;;  %v254_v12 = vsel %vm251_vm0, 0.0, %v250_v9 }
  0x24   : > { %253 = vst [vmem:[%s224_s23] sm:$0x3] %v252_v11  ;;  %255 = vst [vmem:[#allocation2] sm:$0x3] %v254_v12 }
  0x25 PF: > { %s13_s14 = sadd.s32 1, %s417_s14   ;;  %s484_s12 = smov %s413_s13 }
  0x26   : > { %p10_p6 = scmp.ge.s32.totalorder %s13_s14, 6   ;;  %s485_s13 = smov %s487_s15 }
  0x28   :  { %12 = sbr.rel (!%p10_p6) target bundleno = 2 (0x2), region = 72 }

// kernel: token_mixer_forward.2
= control target key start
LH: loop header
LB: loop body
LE: loop exit
PB: predicated region body
PF: predicated region fallthrough
CT: control target
= control target key end

     0   :  { %v555_v0 = vmov 0.0|0.0   ;;  %v556_v4 = vmov 0.0   ;;  %vm557_vm0 = vmmov 0   ;;  %s739_s1 = inlined_call_operand.vmem [shape: f32[128,128], index: 1, kind: input, shape index: {}]   ;;  %s740_s2 = inlined_call_operand.vmem [shape: f32[128,128], index: 2, kind: input, shape index: {}]   ;;  %s741_s0 = inlined_call_operand.vmem [shape: f32[8,128], index: 0, kind: input, shape index: {}]   ;;  %s742_s5 = inlined_call_operand.vmem [shape: f32[8,128], index: 5, kind: output, shape index: {0}]   ;;  %s743_s3 = inlined_call_operand.vmem [shape: f32[1,128], index: 3, kind: input, shape index: {}]   ;;  %s744_s4 = inlined_call_operand.vmem [shape: f32[1,128], index: 4, kind: input, shape index: {}]   ;;  %s745_s6 = inlined_call_operand.vmem [shape: f32[1,128], index: 6, kind: output, shape index: {1}]   ;;  %s746_s7 = inlined_call_operand.vmem [shape: f32[1,128], index: 7, kind: output, shape index: {2}]  }
   0x1   :  { %478 = vmatprep.subr.bf16.mxu0 %v555_v0  ;;  %v30_v1 = vld [vmem:[%s739_s1] sm:$0xff]  ;;  %v31_v2 = vld [vmem:[%s739_s1 + $0x8] sm:$0xff]  ;;  %v32_v3 = vld [vmem:[%s739_s1 + $0x10] sm:$0xff]  ;;  %27 = vst [vmem:[#allocation2] sm:$0x1] %v556_v4  ;;  %405 = vmatprep.mubr.msk.f32.mxu0 %vm557_vm0, %v556_v4 }
   0x2   :  { %28 = vst [vmem:[#allocation3] sm:$0x1] %v556_v4  ;;  %v479_v5 = vpack.c.bf16 %v31_v2, %v30_v1  ;;  %v33_v6 = vld [vmem:[%s739_s1 + $0x18] sm:$0xff]  ;;  %502 = vmatprep.subr.bf16.mxu1 %v555_v0  ;;  %440 = vmatprep.mubr.msk.f32.mxu1 %vm557_vm0, %v556_v4  ;;  %v34_v8 = vld [vmem:[%s739_s1 + $0x20] sm:$0xff]  ;;  %v35_v9 = vld [vmem:[%s739_s1 + $0x28] sm:$0xff] }
   0x3   :  { %v482_v7 = vpack.c.bf16 %v33_v6, %v32_v3  ;;  %v140_v10 = vld [vmem:[%s740_s2] sm:$0xff]  ;;  %v141_v11 = vld [vmem:[%s740_s2 + $0x8] sm:$0xff]  ;;  %v142_v12 = vld [vmem:[%s740_s2 + $0x10] sm:$0xff]  ;;  %v485_v14 = vpack.c.bf16 %v35_v9, %v34_v8 }
   0x4   :  { %480 = vmatpush3.bf16.msra.mxu0 %v479_v5  ;;  %v143_v13 = vld [vmem:[%s740_s2 + $0x18] sm:$0xff]  ;;  %v503_v15 = vpack.c.bf16 %v141_v11, %v140_v10  ;;  %v36_v16 = vld [vmem:[%s739_s1 + $0x30] sm:$0xff]  ;;  %v38_v20 = vld [vmem:[%s739_s1 + $0x40] sm:$0xff] }
   0x5   :  { %481 = vmatprep.subr.bf16.mxu0 %v555_v0  ;;  %v37_v17 = vld [vmem:[%s739_s1 + $0x38] sm:$0xff]  ;;  %v506_v18 = vpack.c.bf16 %v143_v13, %v142_v12  ;;  %v39_v21 = vld [vmem:[%s739_s1 + $0x48] sm:$0xff]  ;;  %v40_v23 = vld [vmem:[%s739_s1 + $0x50] sm:$0xff] }
   0x6   :  { %504 = vmatpush3.bf16.msra.mxu1 %v503_v15  ;;  %v488_v19 = vpack.c.bf16 %v37_v17, %v36_v16  ;;  %v491_v22 = vpack.c.bf16 %v39_v21, %v38_v20  ;;  %v41_v24 = vld [vmem:[%s739_s1 + $0x58] sm:$0xff]  ;;  %v42_v26 = vld [vmem:[%s739_s1 + $0x60] sm:$0xff]  ;;  %v43_v27 = vld [vmem:[%s739_s1 + $0x68] sm:$0xff] }
   0x7   :  { %505 = vmatprep.subr.bf16.mxu1 %v555_v0  ;;  %v494_v25 = vpack.c.bf16 %v41_v24, %v40_v23  ;;  %v497_v28 = vpack.c.bf16 %v43_v27, %v42_v26  ;;  %v44_v29 = vld [vmem:[%s739_s1 + $0x70] sm:$0xff]  ;;  %v45_v30 = vld [vmem:[%s739_s1 + $0x78] sm:$0xff]  ;;  %v29_v32 = vld [vmem:[%s741_s0] sm:$0xff] }
   0x8   :  { %483 = vmatpush3.bf16.msra.mxu0 %v482_v7  ;;  %v500_v31 = vpack.c.bf16 %v45_v30, %v44_v29  ;;  %v144_v33 = vld [vmem:[%s740_s2 + $0x20] sm:$0xff]  ;;  %v145_v34 = vld [vmem:[%s740_s2 + $0x28] sm:$0xff]  ;;  %v146_v36 = vld [vmem:[%s740_s2 + $0x30] sm:$0xff] }
   0x9   :  { %484 = vmatprep.subr.bf16.mxu0 %v555_v0  ;;  %v509_v35 = vpack.c.bf16 %v145_v34, %v144_v33  ;;  %v147_v37 = vld [vmem:[%s740_s2 + $0x38] sm:$0xff]  ;;  %v148_v39 = vld [vmem:[%s740_s2 + $0x40] sm:$0xff]  ;;  %v149_v40 = vld [vmem:[%s740_s2 + $0x48] sm:$0xff] }
   0xa   :  { %507 = vmatpush3.bf16.msra.mxu1 %v506_v18  ;;  %v512_v38 = vpack.c.bf16 %v147_v37, %v146_v36  ;;  %v515_v41 = vpack.c.bf16 %v149_v40, %v148_v39  ;;  %v150_v42 = vld [vmem:[%s740_s2 + $0x50] sm:$0xff]  ;;  %v151_v43 = vld [vmem:[%s740_s2 + $0x58] sm:$0xff]  ;;  %v152_v45 = vld [vmem:[%s740_s2 + $0x60] sm:$0xff] }
   0xb   :  { %508 = vmatprep.subr.bf16.mxu1 %v555_v0  ;;  %v518_v44 = vpack.c.bf16 %v151_v43, %v150_v42  ;;  %v153_v46 = vld [vmem:[%s740_s2 + $0x68] sm:$0xff]  ;;  %v154_v48 = vld [vmem:[%s740_s2 + $0x70] sm:$0xff]  ;;  %v155_v49 = vld [vmem:[%s740_s2 + $0x78] sm:$0xff] }
   0xc   :  { %486 = vmatpush3.bf16.msra.mxu0 %v485_v14  ;;  %v521_v47 = vpack.c.bf16 %v153_v46, %v152_v45  ;;  %v524_v50 = vpack.c.bf16 %v155_v49, %v154_v48  ;;  %v117_v63 = vld [vmem:[#allocation2] sm:$0x1]  ;;  %v126_v2 = vld [vmem:[#allocation3] sm:$0x1] }
   0xd   :  { %487 = vmatprep.subr.bf16.mxu0 %v555_v0  ;;  %v303_v17 = vld [vmem:[%s743_s3] sm:$0x1] }
   0xe   :  { %510 = vmatpush3.bf16.msra.mxu1 %v509_v35  ;;  %v306_v20 = vld [vmem:[%s744_s4] sm:$0x1] }
   0xf   :  { %511 = vmatprep.subr.bf16.mxu1 %v555_v0 }
  0x10   :  { %489 = vmatpush3.bf16.msra.mxu0 %v488_v19 }
  0x11   :  { %490 = vmatprep.subr.bf16.mxu0 %v555_v0 }
  0x12   :  { %513 = vmatpush3.bf16.msra.mxu1 %v512_v38 }
  0x13   :  { %514 = vmatprep.subr.bf16.mxu1 %v555_v0 }
  0x14   :  { %492 = vmatpush3.bf16.msra.mxu0 %v491_v22 }
  0x15   :  { %493 = vmatprep.subr.bf16.mxu0 %v555_v0 }
  0x16   :  { %516 = vmatpush3.bf16.msra.mxu1 %v515_v41 }
  0x17   :  { %517 = vmatprep.subr.bf16.mxu1 %v555_v0 }
  0x18   :  { %495 = vmatpush3.bf16.msra.mxu0 %v494_v25 }
  0x19   :  { %496 = vmatprep.subr.bf16.mxu0 %v555_v0 }
  0x1a   :  { %519 = vmatpush3.bf16.msra.mxu1 %v518_v44 }
  0x1b   :  { %520 = vmatprep.subr.bf16.mxu1 %v555_v0 }
  0x1c   :  { %498 = vmatpush3.bf16.msra.mxu0 %v497_v28 }
  0x1d   :  { %499 = vmatprep.subr.bf16.mxu0 %v555_v0 }
  0x1e   :  { %522 = vmatpush3.bf16.msra.mxu1 %v521_v47 }
  0x1f   :  { %523 = vmatprep.subr.bf16.mxu1 %v555_v0 }
  0x20   :  { %501 = vmatpush3.bf16.msra.mxu0 %v500_v31 }
  0x21   :  { %526 = vmatprep.subr.bf16.mxu0 %v555_v0 }
  0x22   :  { %525 = vmatpush3.bf16.msra.mxu1 %v524_v50 }
  0x23   :  { %406 = vmatmul.mubr.f32.vlgmr.msra.gmra.mrb[0].mxu0 %v29_v32 }
  0x24   :  { %528 = vmatpush3.bf16.msra.mxu0 %v503_v15  ;;  %475 = vmatprep.mubr.msk.f32.mxu0 %vm557_vm0, %v556_v4 }
  0x25   :  { %529 = vmatprep.subr.bf16.mxu0 %v555_v0 }
  0x28   :  { %531 = vmatpush3.bf16.msra.mxu0 %v506_v18 }
  0x29   :  { %532 = vmatprep.subr.bf16.mxu0 %v555_v0 }
  0x2c   :  { %534 = vmatpush3.bf16.msra.mxu0 %v509_v35 }
  0x2d   :  { %535 = vmatprep.subr.bf16.mxu0 %v555_v0 }
  0x30   :  { %537 = vmatpush3.bf16.msra.mxu0 %v512_v38 }
  0x31   :  { %538 = vmatprep.subr.bf16.mxu0 %v555_v0 }
  0x34   :  { %540 = vmatpush3.bf16.msra.mxu0 %v515_v41 }
  0x35   :  { %541 = vmatprep.subr.bf16.mxu0 %v555_v0 }
  0x38   :  { %543 = vmatpush3.bf16.msra.mxu0 %v518_v44 }
  0x39   :  { %544 = vmatprep.subr.bf16.mxu0 %v555_v0 }
  0x3c   :  { %546 = vmatpush3.bf16.msra.mxu0 %v521_v47 }
  0x3d   :  { %547 = vmatprep.subr.bf16.mxu0 %v555_v0 }
  0x40   :  { %549 = vmatpush3.bf16.msra.mxu0 %v524_v50 }
  0xf6   :  { %v112_v51 = vpop.f32.mrb[0].mxu0 }
  0xf7   :  { %116 = vst [vmem:[%s742_s5] sm:$0xff] %v112_v51  ;;  %v118_v52 = vrot.slane %v112_v51, 4  ;;  %v127_v53 = vmul.f32 %v112_v51, %v112_v51  ;;  %v407_v54 = vpop.f32.mrb[1].mxu0 }
  0xf9   :  { %v119_v55 = vadd.f32 %v118_v52, %v112_v51  ;;  %v128_v56 = vrot.slane %v127_v53, 4 }
  0xfb   :  { %v120_v57 = vrot.slane %v119_v55, 2  ;;  %v129_v58 = vadd.f32 %v128_v56, %v127_v53 }
  0xfd   :  { %v121_v59 = vadd.f32 %v120_v57, %v119_v55  ;;  %v130_v60 = vrot.slane %v129_v58, 2 }
  0xff   :  { %v122_v61 = vrot.slane %v121_v59, 1  ;;  %v131_v62 = vadd.f32 %v130_v60, %v129_v58 }
 0x101   :  { %v123_v0 = vadd.f32 %v122_v61, %v121_v59  ;;  %v132_v1 = vrot.slane %v131_v62, 1 }
 0x103   :  { %v124_v3 = vadd.f32 %v123_v0, %v117_v63  ;;  %v133_v4 = vadd.f32 %v132_v1, %v131_v62 }
 0x105   :  { %125 = vst [vmem:[#allocation2] sm:$0x1] %v124_v3  ;;  %v134_v5 = vadd.f32 %v133_v4, %v126_v2 }
 0x107   :  { %135 = vst [vmem:[#allocation3] sm:$0x1] %v134_v5 }
 0x10c   :  { %v139_v6 = vld [vmem:[#allocation2] sm:$0x1] }
 0x10d   :  { %441 = vmatmul.mubr.f32.vlgmr.msra.gmra.mrb[0].mxu1 %v139_v6 }
 0x10e   :  { %v227_v7 = vld [vmem:[#allocation3] sm:$0x1] }
 0x10f   :  { %476 = vmatmul.mubr.f32.vlgmr.msra.gmra.mrb[2].mxu0 %v227_v7 }
 0x1e0   :  { %v222_v8 = vpop.f32.mrb[0].mxu1 }
 0x1e1   :  { %v226_v9 = vmul.f32 0.0078125, %v222_v8  ;;  %v442_v10 = vpop.f32.mrb[1].mxu1 }
 0x1e2   :  { %v294_v11 = vpop.f32.mrb[2].mxu0 }
 0x1e3   :  { %v299_v12 = vmul.f32 %v226_v9, %v226_v9  ;;  %v298_v13 = vmul.f32 0.0078125, %v294_v11  ;;  %v477_v14 = vpop.f32.mrb[3].mxu0 }
 0x1e5   :  { %v300_v15 = vsub.f32 %v298_v13, %v299_v12 }
 0x1e7   :  { %v301_v16 = vadd.f32 1e-05, %v300_v15 }
 0x1e9   :  { %553 = vrsqrt.f32 %v301_v16 }
 0x1f3   :  { %v554_v18 = vpop.eup %553 }
 0x1f4   :  { %v304_v19 = vmul.f32 %v554_v18, %v303_v17 }
 0x1f6   :  { %305 = vst [vmem:[%s745_s6] sm:$0x1] %v304_v19  ;;  %v307_v21 = vmul.f32 %v304_v19, %v226_v9 }
 0x1f8   :  { %v308_v22 = vsub.f32 %v306_v20, %v307_v21 }
 0x1fa   :  { %309 = vst [vmem:[%s746_s7] sm:$0x1] %v308_v22 }

</bundles_post_ra>
